<compile_context>
chip_gen: v6e
topology: v6e:2x2x1
jax: 0.10.0
libtpu: 0.0.40
codegen_flags: <defaults>
</compile_context>

<pallas_src>
import jax
import jax.numpy as jnp
from jax.experimental import pallas as pl
from jax.experimental.pallas import tpu as pltpu

SUBLANE = 8


def _round_up(n, m):
    return ((n + m - 1) // m) * m


def mlp_kernel(x_ref, w1_ref, b1_ref, w2_ref, b2_ref, o_ref):
    # In-kernel bf16 cast of the activation (cheap VPU op, hidden under the MXU).
    x = x_ref[...].astype(jnp.bfloat16)
    # fc1: bf16 x bf16 -> f32 accumulate on the MXU.
    h = jnp.dot(x, w1_ref[...], preferred_element_type=jnp.float32)
    # Bias add (VPU) + sigmoid (EUP transcendental) in f32.
    h = jax.nn.sigmoid(h + b1_ref[...])
    # fc2: recast the hidden activations to bf16 to stay on the fast MXU path.
    out = jnp.dot(h.astype(jnp.bfloat16), w2_ref[...],
                  preferred_element_type=jnp.float32)
    o_ref[...] = (out + b2_ref[...]).astype(o_ref.dtype)


def prepare_params(w1, b1, w2, b2):
    """One-time parameter prep (hoisted out of the forward pass).

    w1: [D, H], b1: [H] or [1, H], w2: [H, C], b2: [C] or [1, C].
    Returns (w1_bf16, b1_f32[1,H], w2_bf16, b2_f32[1,C]).
    """
    w1b = w1.astype(jnp.bfloat16)
    w2b = w2.astype(jnp.bfloat16)
    b1f = jnp.asarray(b1, jnp.float32).reshape(1, w1.shape[1])
    b2f = jnp.asarray(b2, jnp.float32).reshape(1, w2.shape[1])
    return w1b, b1f, w2b, b2f


def nn_forward(x, params, *, block_b=512):
    """Forward pass of NN: sigmoid(x @ W1 + b1) @ W2 + b2.

    x: [B, D] f32; params from prepare_params(). Returns [B, C] f32.
    """
    w1, b1, w2, b2 = params
    B, D = x.shape
    H = w1.shape[1]
    C = w2.shape[1]

    # Batch tile: multiple of 8 sublanes, no larger than (rounded-up) B.
    block_b = max(SUBLANE, min(block_b, _round_up(B, SUBLANE)))
    block_b = _round_up(block_b, SUBLANE)
    Bp = _round_up(B, block_b)

    # Pad the batch only when strictly necessary (kept out of the fast path).
    x_in = x
    if Bp != B:
        x_in = jnp.zeros((Bp, D), x.dtype).at[:B].set(x)

    num_blocks = Bp // block_b

    # Resident-weight VMEM guard (weights + biases + double-buffered x/out tiles).
    resident_bytes = (w1.size + w2.size) * 2 + (b1.size + b2.size) * 4
    tile_bytes = 2 * block_b * (D + C) * 4  # double-buffered in/out f32 tiles
    assert resident_bytes + tile_bytes < 24 * 1024 * 1024, (
        "weights too large for the resident-weight design; add a K-split grid axis")

    cost = pl.CostEstimate(
        flops=2 * Bp * (D * H + H * C),
        transcendentals=Bp * H,
        bytes_accessed=(Bp * D * 4 + w1.size * 2 + w2.size * 2
                        + b1.size * 4 + b2.size * 4 + Bp * C * 4),
    )

    # Only invite the v7x dual-TC split when there are enough grid steps for it
    # to pay for the duplicated resident-weight DMA.
    semantics = ("parallel",) if num_blocks >= 4 else ("arbitrary",)

    out = pl.pallas_call(
        mlp_kernel,
        out_shape=jax.ShapeDtypeStruct((Bp, C), jnp.float32),
        grid=(num_blocks,),
        in_specs=[
            pl.BlockSpec((block_b, D), lambda i: (i, 0)),  # x: tiled over batch
            pl.BlockSpec((D, H), lambda i: (0, 0)),        # W1 resident
            pl.BlockSpec((1, H), lambda i: (0, 0)),        # b1 resident
            pl.BlockSpec((H, C), lambda i: (0, 0)),        # W2 resident
            pl.BlockSpec((1, C), lambda i: (0, 0)),        # b2 resident
        ],
        out_specs=pl.BlockSpec((block_b, C), lambda i: (i, 0)),
        compiler_params=pltpu.CompilerParams(dimension_semantics=semantics),
        cost_estimate=cost,
    )(x_in, w1, b1, w2, b2)

    return out if Bp == B else out[:B]


def reference_forward(x, params):
    # Numerically matches the kernel: bf16 matmul inputs, f32 accumulation,
    # f32 bias add + sigmoid.
    w1, b1, w2, b2 = params
    bf16, f32 = jnp.bfloat16, jnp.float32
    h = jnp.dot(x.astype(bf16), w1, preferred_element_type=f32)
    h = jax.nn.sigmoid(h + b1)
    out = jnp.dot(h.astype(bf16), w2, preferred_element_type=f32)
    return out + b2


if __name__ == "__main__":
    # Shapes implied by the module: x: [batch, input_size]; hidden_size = 64;
    # num_classes = train_y.shape[1] (NIST36-style -> 36 here).
    batch = 256
    input_size = 128
    hidden_size = 64
    num_classes = 36

    key = jax.random.PRNGKey(0)
    kx, k1, k2, k3, k4 = jax.random.split(key, 5)

    x = jax.random.normal(kx, (batch, input_size), dtype=jnp.float32)

    # Deterministic parameter init (uniform ~ PyTorch Linear default 1/sqrt(fan_in)),
    # stored [in, out] so the kernel computes x @ W directly.
    s1 = 1.0 / jnp.sqrt(input_size)
    s2 = 1.0 / jnp.sqrt(hidden_size)
    w1 = jax.random.uniform(k1, (input_size, hidden_size), jnp.float32, -s1, s1)
    b1 = jax.random.uniform(k2, (hidden_size,), jnp.float32, -s1, s1)
    w2 = jax.random.uniform(k3, (hidden_size, num_classes), jnp.float32, -s2, s2)
    b2 = jax.random.uniform(k4, (num_classes,), jnp.float32, -s2, s2)

    # One-time parameter prep (bf16 cast / bias reshape) hoisted out of forward.
    params = prepare_params(w1, b1, w2, b2)
    params = jax.block_until_ready(params)

    out = nn_forward(x, params)   # block_b >= B -> grid=(1,), no wrapper pad/slice
    out = jax.block_until_ready(out)

    ref = reference_forward(x, params)
    assert out.shape == (batch, num_classes)
    assert jnp.allclose(out, ref, atol=5e-3, rtol=5e-3), "mismatch vs reference"

    print("KERNEL_OK")
</pallas_src>

<mosaic_0001>
module attributes {stable_mosaic.version = 11 : i64} {
  func.func @mlp_kernel(%arg0: i32, %arg1: memref<256x128xf32, #tpu.memory_space<vmem>>, %arg2: memref<128x64xbf16, #tpu.memory_space<vmem>>, %arg3: memref<1x64xf32, #tpu.memory_space<vmem>>, %arg4: memref<64x36xbf16, #tpu.memory_space<vmem>>, %arg5: memref<1x36xf32, #tpu.memory_space<vmem>>, %arg6: memref<256x36xf32, #tpu.memory_space<vmem>>) attributes {dimension_semantics = [#tpu.dimension_semantics<arbitrary>], iteration_bounds = array<i64: 1>, scalar_prefetch = 0 : i64, scratch_operands = 0 : i64, tpu.core_type = #tpu.core_type<tc>, window_params = [{transform_indices = @transform_0, window_bounds = array<i64: 256, 128>}, {pipeline_mode = #tpu.pipeline_mode<synchronous>, transform_indices = @transform_1, window_bounds = array<i64: 128, 64>}, {pipeline_mode = #tpu.pipeline_mode<synchronous>, transform_indices = @transform_2, window_bounds = array<i64: 1, 64>}, {pipeline_mode = #tpu.pipeline_mode<synchronous>, transform_indices = @transform_3, window_bounds = array<i64: 64, 36>}, {pipeline_mode = #tpu.pipeline_mode<synchronous>, transform_indices = @transform_4, window_bounds = array<i64: 1, 36>}, {transform_indices = @transform_5, window_bounds = array<i64: 256, 36>}]} {
    %c0 = arith.constant 0 : index
    %c0_0 = arith.constant 0 : index
    %0 = vector.load %arg1[%c0, %c0_0] : memref<256x128xf32, #tpu.memory_space<vmem>>, vector<256x128xf32>
    %1 = arith.truncf %0 : vector<256x128xf32> to vector<256x128xbf16>
    %c0_1 = arith.constant 0 : index
    %c0_2 = arith.constant 0 : index
    %2 = vector.load %arg2[%c0_1, %c0_2] : memref<128x64xbf16, #tpu.memory_space<vmem>>, vector<128x64xbf16>
    %cst = arith.constant dense<0.000000e+00> : vector<256x64xf32>
    %3 = tpu.matmul %1, %2, %cst {dimension_numbers = #tpu.dot_dimension_numbers<[1], [0], [0], [1], [0, 0, 1, 1], [], []>} : vector<256x128xbf16>, vector<128x64xbf16>, vector<256x64xf32> -> vector<256x64xf32>
    %c0_3 = arith.constant 0 : index
    %c0_4 = arith.constant 0 : index
    %4 = vector.load %arg3[%c0_3, %c0_4] : memref<1x64xf32, #tpu.memory_space<vmem>>, vector<1x64xf32>
    %5 = vector.broadcast %4 : vector<1x64xf32> to vector<256x64xf32>
    %6 = arith.addf %3, %5 : vector<256x64xf32>
    %7 = arith.negf %6 : vector<256x64xf32>
    %8 = math.exp %7 : vector<256x64xf32>
    %cst_5 = arith.constant 1.000000e+00 : f32
    %9 = vector.broadcast %cst_5 : f32 to vector<256x64xf32>
    %10 = arith.addf %9, %8 : vector<256x64xf32>
    %11 = arith.divf %9, %10 : vector<256x64xf32>
    %12 = arith.truncf %11 : vector<256x64xf32> to vector<256x64xbf16>
    %c0_6 = arith.constant 0 : index
    %c0_7 = arith.constant 0 : index
    %13 = vector.load %arg4[%c0_6, %c0_7] : memref<64x36xbf16, #tpu.memory_space<vmem>>, vector<64x36xbf16>
    %cst_8 = arith.constant dense<0.000000e+00> : vector<256x36xf32>
    %14 = tpu.matmul %12, %13, %cst_8 {dimension_numbers = #tpu.dot_dimension_numbers<[1], [0], [0], [1], [0, 0, 1, 1], [], []>} : vector<256x64xbf16>, vector<64x36xbf16>, vector<256x36xf32> -> vector<256x36xf32>
    %c0_9 = arith.constant 0 : index
    %c0_10 = arith.constant 0 : index
    %15 = vector.load %arg5[%c0_9, %c0_10] : memref<1x36xf32, #tpu.memory_space<vmem>>, vector<1x36xf32>
    %16 = vector.broadcast %15 : vector<1x36xf32> to vector<256x36xf32>
    %17 = arith.addf %14, %16 : vector<256x36xf32>
    %c0_11 = arith.constant 0 : index
    %c0_12 = arith.constant 0 : index
    %18 = vector.load %arg6[%c0_11, %c0_12] : memref<256x36xf32, #tpu.memory_space<vmem>>, vector<256x36xf32>
    tpu.vector_store %arg6[%c0_11, %c0_12], %17 {strides = array<i32>} : memref<256x36xf32, #tpu.memory_space<vmem>>, vector<256x36xf32>,
    return
  }
  func.func @transform_0(%arg0: i32) -> (i32, i32) {
    %c0_i32 = arith.constant 0 : i32
    %c0_i32_0 = arith.constant 0 : i32
    return %arg0, %c0_i32 : i32, i32
  }
  func.func @transform_1(%arg0: i32) -> (i32, i32) {
    %c0_i32 = arith.constant 0 : i32
    %c0_i32_0 = arith.constant 0 : i32
    %c0_i32_1 = arith.constant 0 : i32
    return %c0_i32, %c0_i32_0 : i32, i32
  }
  func.func @transform_2(%arg0: i32) -> (i32, i32) {
    %c0_i32 = arith.constant 0 : i32
    %c0_i32_0 = arith.constant 0 : i32
    %c0_i32_1 = arith.constant 0 : i32
    return %c0_i32, %c0_i32_0 : i32, i32
  }
  func.func @transform_3(%arg0: i32) -> (i32, i32) {
    %c0_i32 = arith.constant 0 : i32
    %c0_i32_0 = arith.constant 0 : i32
    %c0_i32_1 = arith.constant 0 : i32
    return %c0_i32, %c0_i32_0 : i32, i32
  }
  func.func @transform_4(%arg0: i32) -> (i32, i32) {
    %c0_i32 = arith.constant 0 : i32
    %c0_i32_0 = arith.constant 0 : i32
    %c0_i32_1 = arith.constant 0 : i32
    return %c0_i32, %c0_i32_0 : i32, i32
  }
  func.func @transform_5(%arg0: i32) -> (i32, i32) {
    %c0_i32 = arith.constant 0 : i32
    %c0_i32_0 = arith.constant 0 : i32
    return %arg0, %c0_i32 : i32, i32
  }
}

</mosaic_0001>

<bundles_post_ra>
// kernel: tpu_custom_call.1
= control target key start
LH: loop header
LB: loop body
LE: loop exit
PB: predicated region body
PF: predicated region fallthrough
CT: control target
= control target key end

     0   :  { %10 = vsyncpa [#allocation3], 0  ;;  %s1169_s18 = smov [#allocation2]   ;;  %s1459_s0 = inlined_call_operand.hbm [shape: f32[256,128], index: 0, kind: input, shape index: {}]   ;;  %s1460_s1 = inlined_call_operand.vmem [shape: bf16[128,64], index: 1, kind: input, shape index: {}]   ;;  %s1461_s2 = inlined_call_operand.vmem [shape: f32[1,64], index: 2, kind: input, shape index: {}]   ;;  %s1462_s3 = inlined_call_operand.vmem [shape: bf16[64,36], index: 3, kind: input, shape index: {}]   ;;  %s1463_s4 = inlined_call_operand.vmem [shape: f32[1,36], index: 4, kind: input, shape index: {}]   ;;  %s1464_s5 = inlined_call_operand.vmem [shape: f32[256,36], index: 5, kind: output, shape index: {}]  }
   0x1   :  { %s16_s19 = sshll.u32 %s1169_s18, 4  ;;  %s17_s19 = int_to_ptr.vmem [resolvable:$true] %s16_s19 }
   0x2   :  { %s1155_s20 = scalar_lea.vmem %s17_s19, 4096  ;;  %p1160_p1 = scmp.lt.s32.totalorder %s17_s19, %s17_s19 }
   0x3   :  { %p1156_p0 = scmp.ne.s32.totalorder %s17_s19, %s1155_s20  ;;  %p1161_p2 = scmp.lt.s32.totalorder %s1155_s20, %s1155_s20 }
   0x5   :  { %p1162_p3 = por %p1161_p2, %p1160_p1 }
   0x7   :  { %p1163_p4 = pnand %p1162_p3, %p1156_p0 }
   0x9   :  { %1166 = shalt.err (!%p1163_p4)
}
   0xa   :  { %s1170_s21 = smov 128   ;;  %s1171_s22 = smov 8  }
   0xb   :  { %22 = dma.hbm_to_vmem [thread:$0]  %s1459_s0, 4096, %s17_s19, [#allocation3], %s1170_s21, %s1170_s21, %s1171_s22  }
   0xc   :  { %1167 = dma.done.wait [#allocation3], 4096  }
   0xd   :  { %1168 = vsyncadd [#allocation3], 4294963200  ;;  %v1007_v0 = vld [vmem:[%s1460_s1 + $0x38] sm:$0xff]   ;;  %v1008_v1 = vld [vmem:[%s1460_s1 + $0x30] sm:$0xff]   ;;  %vm562_vm0 = vcmask 523264   ;;  %vm772_vm1 = vcmask 293888  }
   0xe   :  { %916 = vmatprep.subr.bf16.mxu0 %v1007_v0  ;;  %v1009_v2 = vld [vmem:[%s1460_s1 + $0x28] sm:$0xff]   ;;  %v1010_v3 = vld [vmem:[%s1460_s1 + $0x20] sm:$0xff]   ;;  %v1011_v7 = vld [vmem:[%s1460_s1 + $0x18] sm:$0xff]  }
   0xf   :  { %917 = vmatpush3.bf16.msra.mxu0 %v1007_v0  ;;  %v35_v4 = vld [vmem:[#allocation2] sm:$0xff]  ;;  %v36_v5 = vld [vmem:[#allocation2 + $0x8] sm:$0xff]  ;;  %v1012_v8 = vld [vmem:[%s1460_s1 + $0x10] sm:$0xff]  }
  0x10   :  { %918 = vmatprep.subr.bf16.mxu0 %v1008_v1  ;;  %v67_v6 = vpack.c.bf16 %v36_v5, %v35_v4  ;;  %v1013_v9 = vld [vmem:[%s1460_s1 + $0x8] sm:$0xff]   ;;  %v1014_v10 = vld [vmem:[%s1460_s1] sm:$0xff]   ;;  %v37_v11 = vld [vmem:[#allocation2 + $0x10] sm:$0xff] }
  0x11   :  { %v38_v12 = vld [vmem:[#allocation2 + $0x18] sm:$0xff]  ;;  %v39_v13 = vld [vmem:[#allocation2 + $0x20] sm:$0xff]  ;;  %v40_v14 = vld [vmem:[#allocation2 + $0x28] sm:$0xff] }
  0x12   :  { %932 = vmatprep.mubr.bf16.mxu0 %v67_v6  ;;  %v68_v15 = vpack.c.bf16 %v38_v12, %v37_v11  ;;  %v69_v16 = vpack.c.bf16 %v40_v14, %v39_v13  ;;  %v41_v17 = vld [vmem:[#allocation2 + $0x30] sm:$0xff]  ;;  %v42_v18 = vld [vmem:[#allocation2 + $0x38] sm:$0xff]  ;;  %v43_v19 = vld [vmem:[#allocation2 + $0x40] sm:$0xff] }
  0x13   :  { %919 = vmatpush3.bf16.msra.mxu0 %v1008_v1  ;;  %v44_v20 = vld [vmem:[#allocation2 + $0x48] sm:$0xff]  ;;  %v70_v21 = vpack.c.bf16 %v42_v18, %v41_v17  ;;  %v45_v23 = vld [vmem:[#allocation2 + $0x50] sm:$0xff]  ;;  %v46_v24 = vld [vmem:[#allocation2 + $0x58] sm:$0xff] }
  0x14   :  { %920 = vmatprep.subr.bf16.mxu0 %v1009_v2  ;;  %v71_v22 = vpack.c.bf16 %v44_v20, %v43_v19  ;;  %v47_v25 = vld [vmem:[#allocation2 + $0x60] sm:$0xff]  ;;  %v48_v26 = vld [vmem:[#allocation2 + $0x68] sm:$0xff]  ;;  %v72_v27 = vpack.c.bf16 %v46_v24, %v45_v23  ;;  %v49_v29 = vld [vmem:[#allocation2 + $0x70] sm:$0xff] }
  0x15   :  { %v73_v28 = vpack.c.bf16 %v48_v26, %v47_v25  ;;  %v50_v30 = vld [vmem:[#allocation2 + $0x78] sm:$0xff]  ;;  %v51_v31 = vld [vmem:[#allocation2 + $0x80] sm:$0xff]  ;;  %v52_v32 = vld [vmem:[#allocation2 + $0x88] sm:$0xff] }
  0x16   :  { %v74_v33 = vpack.c.bf16 %v50_v30, %v49_v29  ;;  %v75_v34 = vpack.c.bf16 %v52_v32, %v51_v31  ;;  %v53_v35 = vld [vmem:[#allocation2 + $0x90] sm:$0xff]  ;;  %v54_v36 = vld [vmem:[#allocation2 + $0x98] sm:$0xff]  ;;  %v55_v37 = vld [vmem:[#allocation2 + $0xa0] sm:$0xff] }
  0x17   :  { %921 = vmatpush3.bf16.msra.mxu0 %v1009_v2  ;;  %v56_v38 = vld [vmem:[#allocation2 + $0xa8] sm:$0xff]  ;;  %v76_v39 = vpack.c.bf16 %v54_v36, %v53_v35  ;;  %v57_v41 = vld [vmem:[#allocation2 + $0xb0] sm:$0xff]  ;;  %v58_v42 = vld [vmem:[#allocation2 + $0xb8] sm:$0xff] }
  0x18   :  { %922 = vmatprep.subr.bf16.mxu0 %v1010_v3  ;;  %v77_v40 = vpack.c.bf16 %v56_v38, %v55_v37  ;;  %v59_v43 = vld [vmem:[#allocation2 + $0xc0] sm:$0xff]  ;;  %v60_v44 = vld [vmem:[#allocation2 + $0xc8] sm:$0xff]  ;;  %v78_v45 = vpack.c.bf16 %v58_v42, %v57_v41  ;;  %v61_v47 = vld [vmem:[#allocation2 + $0xd0] sm:$0xff] }
  0x19   :  { %v79_v46 = vpack.c.bf16 %v60_v44, %v59_v43  ;;  %v62_v48 = vld [vmem:[#allocation2 + $0xd8] sm:$0xff]  ;;  %v63_v49 = vld [vmem:[#allocation2 + $0xe0] sm:$0xff]  ;;  %v64_v50 = vld [vmem:[#allocation2 + $0xe8] sm:$0xff] }
  0x1a   :  { %v80_v51 = vpack.c.bf16 %v62_v48, %v61_v47  ;;  %v81_v52 = vpack.c.bf16 %v64_v50, %v63_v49  ;;  %v65_v53 = vld [vmem:[#allocation2 + $0xf0] sm:$0xff]  ;;  %v66_v54 = vld [vmem:[#allocation2 + $0xf8] sm:$0xff]  ;;  %v1017_v58 = vld [vmem:[%s1462_s3 + $0x8] sm:$0xff]  }
  0x1b   :  { %923 = vmatpush3.bf16.msra.mxu0 %v1010_v3  ;;  %v82_v55 = vpack.c.bf16 %v66_v54, %v65_v53  ;;  %v1015_v56 = vld [vmem:[%s1462_s3 + $0x18] sm:$0xff]   ;;  %v1016_v57 = vld [vmem:[%s1462_s3 + $0x10] sm:$0xff]   ;;  %v1018_v59 = vld [vmem:[%s1462_s3] sm:$0xff]  }
  0x1c   :  { %924 = vmatprep.subr.bf16.mxu0 %v1011_v7  ;;  %964 = vmatprep.subr.bf16.mxu1 %v1015_v56  ;;  %v1244_v60 = vld [vmem:[%s1461_s2] ss:$0 sm:$0xff] }
  0x1d   :  { %965 = vmatpush3.bf16.msra.mxu1 %v1015_v56 }
  0x1e   :  { %966 = vmatprep.subr.bf16.mxu1 %v1016_v57 }
  0x1f   :  { %925 = vmatpush3.bf16.msra.mxu0 %v1011_v7 }
  0x20   :  { %926 = vmatprep.subr.bf16.mxu0 %v1012_v8 }
  0x21   :  { %967 = vmatpush3.bf16.msra.mxu1 %v1016_v57 }
  0x22   :  { %968 = vmatprep.subr.bf16.mxu1 %v1017_v58 }
  0x23   :  { %927 = vmatpush3.bf16.msra.mxu0 %v1012_v8 }
  0x24   :  { %928 = vmatprep.subr.bf16.mxu0 %v1013_v9 }
  0x25   :  { %969 = vmatpush3.bf16.msra.mxu1 %v1017_v58 }
  0x26   :  { %970 = vmatprep.subr.bf16.mxu1 %v1018_v59 }
  0x27   :  { %929 = vmatpush3.bf16.msra.mxu0 %v1013_v9 }
  0x28   :  { %930 = vmatprep.subr.bf16.mxu0 %v1014_v10 }
  0x29   :  { %971 = vmatpush3.bf16.msra.mxu1 %v1018_v59 }
  0x2b   :  { %931 = vmatpush3.bf16.msra.mxu0 %v1014_v10 }
  0x2e   :  { %933 = vmatmul.mubr.bf16.vlgmr.msra.gmra.mxu0 %v68_v15 }
  0x2f   :  { %936 = vmatprep.mubr.bf16.mxu0 %v69_v16 }
  0x36   :  { %937 = vmatmul.mubr.bf16.gmra.mxu0 %v70_v21 }
  0x37   :  { %940 = vmatprep.mubr.bf16.mxu0 %v71_v22 }
  0x3e   :  { %941 = vmatmul.mubr.bf16.gmra.mxu0 %v72_v27 }
  0x3f   :  { %944 = vmatprep.mubr.bf16.mxu0 %v73_v28 }
  0x46   :  { %945 = vmatmul.mubr.bf16.gmra.mxu0 %v74_v33 }
  0x47   :  { %948 = vmatprep.mubr.bf16.mxu0 %v75_v34 }
  0x4e   :  { %949 = vmatmul.mubr.bf16.gmra.mxu0 %v76_v39 }
  0x4f   :  { %952 = vmatprep.mubr.bf16.mxu0 %v77_v40 }
  0x56   :  { %953 = vmatmul.mubr.bf16.gmra.mxu0 %v78_v45 }
  0x57   :  { %956 = vmatprep.mubr.bf16.mxu0 %v79_v46 }
  0x5e   :  { %957 = vmatmul.mubr.bf16.gmra.mxu0 %v80_v51 }
  0x5f   :  { %960 = vmatprep.mubr.bf16.mxu0 %v81_v52 }
  0x66   :  { %961 = vmatmul.mubr.bf16.gmra.mxu0 %v82_v55 }
  0xee   :  { %v934_v61 = vpop.f32.mrf.mxu0 }
  0xef   :  { %v197_v62 = vadd.f32 %v934_v61, %v1244_v60 }
  0xf0   :  { %v188_v63 = vpop.f32.mrf.mxu0 }
  0xf1   :  { %v821_v0 = vmul.f32 -1.442695, %v197_v62  ;;  %v189_v1 = vadd.f32 %v1244_v60, %v188_v63 }
  0xf2   :  { %v935_v2 = vpop.f32.mrf.mxu0 }
  0xf3   :  { %1019 = vpow2.f32 %v821_v0  ;;  %v819_v3 = vmul.f32 -1.442695, %v189_v1  ;;  %v200_v4 = vadd.f32 %v935_v2, %v1244_v60 }
  0xf4   :  { %v191_v5 = vpop.f32.mrf.mxu0 }
  0xf5   :  { %1021 = vpow2.f32 %v819_v3  ;;  %v822_v6 = vmul.f32 -1.442695, %v200_v4  ;;  %v192_v7 = vadd.f32 %v1244_v60, %v191_v5 }
  0xf6   :  { %v938_v8 = vpop.f32.mrf.mxu0 }
  0xf7   :  { %1023 = vpow2.f32 %v822_v6  ;;  %v820_v9 = vmul.f32 -1.442695, %v192_v7  ;;  %v213_v10 = vadd.f32 %v938_v8, %v1244_v60 }
  0xf8   :  { %v204_v11 = vpop.f32.mrf.mxu0 }
  0xf9   :  { %1025 = vpow2.f32 %v820_v9  ;;  %v825_v12 = vmul.f32 -1.442695, %v213_v10  ;;  %v205_v13 = vadd.f32 %v1244_v60, %v204_v11 }
  0xfa   :  { %v939_v14 = vpop.f32.mrf.mxu0 }
  0xfb   :  { %1027 = vpow2.f32 %v825_v12  ;;  %v823_v15 = vmul.f32 -1.442695, %v205_v13  ;;  %v216_v16 = vadd.f32 %v939_v14, %v1244_v60 }
  0xfc   :  { %v207_v17 = vpop.f32.mrf.mxu0 }
  0xfd   :  { %1029 = vpow2.f32 %v823_v15  ;;  %v826_v18 = vmul.f32 -1.442695, %v216_v16  ;;  %v208_v19 = vadd.f32 %v1244_v60, %v207_v17 }
  0xfe   :  { %v942_v20 = vpop.f32.mrf.mxu0 }
  0xff   :  { %1031 = vpow2.f32 %v826_v18  ;;  %v824_v21 = vmul.f32 -1.442695, %v208_v19  ;;  %v229_v22 = vadd.f32 %v942_v20, %v1244_v60 }
 0x100   :  { %v1020_v23 = vpop.eup %1019  ;;  %v220_v24 = vpop.f32.mrf.mxu0 }
 0x101   :  { %v413_v25 = vadd.f32 1.0, %v1020_v23  ;;  %1033 = vpow2.f32 %v824_v21  ;;  %v829_v26 = vmul.f32 -1.442695, %v229_v22  ;;  %v221_v27 = vadd.f32 %v1244_v60, %v220_v24 }
 0x102   :  { %v1022_v28 = vpop.eup %1021  ;;  %v943_v29 = vpop.f32.mrf.mxu0 }
 0x103   :  { %1035 = vrcp.f32 %v413_v25  ;;  %v411_v30 = vadd.f32 1.0, %v1022_v28  ;;  %v827_v31 = vmul.f32 -1.442695, %v221_v27  ;;  %v232_v32 = vadd.f32 %v943_v29, %v1244_v60 }
 0x104   :  { %v1024_v33 = vpop.eup %1023  ;;  %1037 = vpow2.f32 %v829_v26  ;;  %v223_v34 = vpop.f32.mrf.mxu0 }
 0x105   :  { %1039 = vrcp.f32 %v411_v30  ;;  %v414_v35 = vadd.f32 1.0, %v1024_v33  ;;  %v830_v36 = vmul.f32 -1.442695, %v232_v32  ;;  %v224_v37 = vadd.f32 %v1244_v60, %v223_v34 }
 0x106   :  { %v1026_v38 = vpop.eup %1025  ;;  %1041 = vpow2.f32 %v827_v31  ;;  %v946_v39 = vpop.f32.mrf.mxu0 }
 0x107   :  { %1043 = vrcp.f32 %v414_v35  ;;  %v412_v40 = vadd.f32 1.0, %v1026_v38  ;;  %v828_v41 = vmul.f32 -1.442695, %v224_v37  ;;  %v245_v42 = vadd.f32 %v946_v39, %v1244_v60 }
 0x108   :  { %v1028_v43 = vpop.eup %1027  ;;  %1045 = vpow2.f32 %v830_v36  ;;  %v236_v44 = vpop.f32.mrf.mxu0 }
 0x109   :  { %1047 = vrcp.f32 %v412_v40  ;;  %v417_v45 = vadd.f32 1.0, %v1028_v43  ;;  %v833_v46 = vmul.f32 -1.442695, %v245_v42  ;;  %v237_v47 = vadd.f32 %v1244_v60, %v236_v44 }
 0x10a   :  { %v1030_v48 = vpop.eup %1029  ;;  %1049 = vpow2.f32 %v828_v41  ;;  %v947_v49 = vpop.f32.mrf.mxu0 }
 0x10b   :  { %1051 = vrcp.f32 %v417_v45  ;;  %v415_v50 = vadd.f32 1.0, %v1030_v48  ;;  %v831_v51 = vmul.f32 -1.442695, %v237_v47  ;;  %v248_v52 = vadd.f32 %v947_v49, %v1244_v60 }
 0x10c   :  { %v1032_v53 = vpop.eup %1031  ;;  %1053 = vpow2.f32 %v833_v46  ;;  %v239_v54 = vpop.f32.mrf.mxu0 }
 0x10d   :  { %1055 = vrcp.f32 %v415_v50  ;;  %v418_v55 = vadd.f32 1.0, %v1032_v53  ;;  %v834_v56 = vmul.f32 -1.442695, %v248_v52  ;;  %v240_v57 = vadd.f32 %v1244_v60, %v239_v54 }
 0x10e   :  { %v1034_v58 = vpop.eup %1033  ;;  %1057 = vpow2.f32 %v831_v51  ;;  %v950_v59 = vpop.f32.mrf.mxu0 }
 0x10f   :  { %1059 = vrcp.f32 %v418_v55  ;;  %v416_v61 = vadd.f32 1.0, %v1034_v58  ;;  %v832_v62 = vmul.f32 -1.442695, %v240_v57  ;;  %v261_v63 = vadd.f32 %v950_v59, %v1244_v60 }
 0x110   :  { %v1036_v0 = vpop.eup %1035  ;;  %1061 = vpow2.f32 %v834_v56  ;;  %v252_v1 = vpop.f32.mrf.mxu0 }
 0x111   :  { %v1038_v2 = vpop.eup %1037  ;;  %1063 = vrcp.f32 %v416_v61  ;;  %v837_v3 = vmul.f32 -1.442695, %v261_v63  ;;  %v253_v4 = vadd.f32 %v1244_v60, %v252_v1 }
 0x112   :  { %v1040_v5 = vpop.eup %1039  ;;  %1065 = vpow2.f32 %v832_v62  ;;  %v951_v6 = vpop.f32.mrf.mxu0  ;;  %v421_v17 = vadd.f32 1.0, %v1038_v2 }
 0x113   :  { %v1042_v7 = vpop.eup %1041  ;;  %v835_v8 = vmul.f32 -1.442695, %v253_v4  ;;  %v264_v9 = vadd.f32 %v951_v6, %v1244_v60  ;;  %1067 = vpow2.f32 %v837_v3 }
 0x114   :  { %v1044_v10 = vpop.eup %1043  ;;  %v419_v11 = vadd.f32 1.0, %v1042_v7  ;;  %v255_v12 = vpop.f32.mrf.mxu0 }
 0x115   :  { %v1046_v13 = vpop.eup %1045  ;;  %1069 = vpow2.f32 %v835_v8  ;;  %v838_v14 = vmul.f32 -1.442695, %v264_v9  ;;  %v256_v15 = vadd.f32 %v1244_v60, %v255_v12  ;;  %v508_v27 = vpack.c.bf16 %v1044_v10, %v1036_v0 }
 0x116   :  { %v1048_v16 = vpop.eup %1047  ;;  %1071 = vrcp.f32 %v419_v11  ;;  %v422_v18 = vadd.f32 1.0, %v1046_v13  ;;  %v954_v19 = vpop.f32.mrf.mxu0 }
 0x117   :  { %v1050_v20 = vpop.eup %1049  ;;  %1073 = vpow2.f32 %v838_v14  ;;  %v836_v21 = vmul.f32 -1.442695, %v256_v15  ;;  %v277_v22 = vadd.f32 %v954_v19, %v1244_v60  ;;  %v507_v23 = vpack.c.bf16 %v1048_v16, %v1040_v5 }
 0x118   :  { %v1052_v24 = vpop.eup %1051  ;;  %1075 = vrcp.f32 %v422_v18  ;;  %v420_v25 = vadd.f32 1.0, %v1050_v20  ;;  %v268_v26 = vpop.f32.mrf.mxu0 }
 0x119   :  { %v1054_v28 = vpop.eup %1053  ;;  %1077 = vpow2.f32 %v836_v21  ;;  %v841_v29 = vmul.f32 -1.442695, %v277_v22  ;;  %v269_v30 = vadd.f32 %v1244_v60, %v268_v26  ;;  %972 = vmatprep.mubr.msk.bf16.mxu1 %vm562_vm0, %v507_v23 }
 0x11a   :  { %v1056_v31 = vpop.eup %1055  ;;  %1079 = vrcp.f32 %v420_v25  ;;  %v955_v32 = vpop.f32.mrf.mxu0  ;;  %973 = vmatmul.mubr.msk.bf16.vlgmr.msra.gmra.mxu1 %vm562_vm0, %v508_v27  ;;  %v425_v43 = vadd.f32 1.0, %v1054_v28 }
 0x11b   :  { %v1058_v33 = vpop.eup %1057  ;;  %1081 = vrcp.f32 %v421_v17  ;;  %v839_v34 = vmul.f32 -1.442695, %v269_v30  ;;  %v280_v35 = vadd.f32 %v955_v32, %v1244_v60 }
 0x11c   :  { %v1060_v36 = vpop.eup %1059  ;;  %v423_v37 = vadd.f32 1.0, %v1058_v33  ;;  %1083 = vpow2.f32 %v841_v29  ;;  %v271_v38 = vpop.f32.mrf.mxu0 }
 0x11d   :  { %v1062_v39 = vpop.eup %1061  ;;  %1085 = vpow2.f32 %v839_v34  ;;  %v842_v40 = vmul.f32 -1.442695, %v280_v35  ;;  %v272_v41 = vadd.f32 %v1244_v60, %v271_v38  ;;  %v510_v52 = vpack.c.bf16 %v1060_v36, %v1052_v24 }
 0x11e   :  { %v1064_v42 = vpop.eup %1063  ;;  %1087 = vrcp.f32 %v423_v37  ;;  %v426_v44 = vadd.f32 1.0, %v1062_v39  ;;  %v958_v45 = vpop.f32.mrf.mxu0 }
 0x11f   :  { %v1066_v46 = vpop.eup %1065  ;;  %1089 = vpow2.f32 %v842_v40  ;;  %v840_v47 = vmul.f32 -1.442695, %v272_v41  ;;  %v293_v48 = vadd.f32 %v958_v45, %v1244_v60  ;;  %v509_v49 = vpack.c.bf16 %v1064_v42, %v1056_v31 }
 0x120   :  { %1091 = vrcp.f32 %v426_v44  ;;  %v424_v50 = vadd.f32 1.0, %v1066_v46  ;;  %v284_v51 = vpop.f32.mrf.mxu0  ;;  %v1068_v53 = vpop.eup %1067 }
 0x121   :  { %1093 = vpow2.f32 %v840_v47  ;;  %v845_v54 = vmul.f32 -1.442695, %v293_v48  ;;  %v285_v55 = vadd.f32 %v1244_v60, %v284_v51  ;;  %976 = vmatprep.mubr.msk.bf16.mxu1 %vm562_vm0, %v509_v49  ;;  %v429_v6 = vadd.f32 1.0, %v1068_v53 }
 0x122   :  { %v1070_v56 = vpop.eup %1069  ;;  %1095 = vrcp.f32 %v424_v50  ;;  %v959_v57 = vpop.f32.mrf.mxu0  ;;  %977 = vmatmul.mubr.msk.bf16.gmra.mxu1 %vm562_vm0, %v510_v52 }
 0x123   :  { %v1072_v58 = vpop.eup %1071  ;;  %1097 = vrcp.f32 %v425_v43  ;;  %v427_v59 = vadd.f32 1.0, %v1070_v56  ;;  %v843_v61 = vmul.f32 -1.442695, %v285_v55  ;;  %v296_v62 = vadd.f32 %v959_v57, %v1244_v60 }
 0x124   :  { %v1074_v63 = vpop.eup %1073  ;;  %1099 = vpow2.f32 %v845_v54  ;;  %v287_v0 = vpop.f32.mrf.mxu0 }
 0x125   :  { %v1076_v1 = vpop.eup %1075  ;;  %1101 = vrcp.f32 %v427_v59  ;;  %v430_v2 = vadd.f32 1.0, %v1074_v63  ;;  %v846_v3 = vmul.f32 -1.442695, %v296_v62  ;;  %v288_v4 = vadd.f32 %v1244_v60, %v287_v0 }
 0x126   :  { %v1078_v5 = vpop.eup %1077  ;;  %1103 = vpow2.f32 %v843_v61  ;;  %v962_v7 = vpop.f32.mrf.mxu0 }
 0x127   :  { %v1080_v8 = vpop.eup %1079  ;;  %1105 = vrcp.f32 %v430_v2  ;;  %v428_v9 = vadd.f32 1.0, %v1078_v5  ;;  %v844_v10 = vmul.f32 -1.442695, %v288_v4  ;;  %v309_v11 = vadd.f32 %v962_v7, %v1244_v60 }
 0x128   :  { %v1082_v12 = vpop.eup %1081  ;;  %1107 = vpow2.f32 %v846_v3  ;;  %v300_v13 = vpop.f32.mrf.mxu0  ;;  %v511_v14 = vpack.c.bf16 %v1080_v8, %v1072_v58 }
 0x129   :  { %v1084_v15 = vpop.eup %1083  ;;  %1109 = vrcp.f32 %v428_v9  ;;  %v849_v16 = vmul.f32 -1.442695, %v309_v11  ;;  %v301_v17 = vadd.f32 %v1244_v60, %v300_v13  ;;  %v512_v18 = vpack.c.bf16 %v1076_v1, %v1082_v12 }
 0x12a   :  { %v1086_v19 = vpop.eup %1085  ;;  %1111 = vpow2.f32 %v844_v10  ;;  %980 = vmatprep.mubr.msk.bf16.mxu1 %vm562_vm0, %v511_v14  ;;  %v963_v20 = vpop.f32.mrf.mxu0  ;;  %v433_v33 = vadd.f32 1.0, %v1084_v15  ;;  %v1297_v15 = vld [vmem:[%s1463_s4] ss:$0 sm:$0xff] }
 0x12b   :  { %v1088_v21 = vpop.eup %1087  ;;  %1113 = vrcp.f32 %v429_v6  ;;  %v431_v22 = vadd.f32 1.0, %v1086_v19  ;;  %v847_v23 = vmul.f32 -1.442695, %v301_v17  ;;  %v312_v24 = vadd.f32 %v963_v20, %v1244_v60  ;;  %981 = vmatmul.mubr.msk.bf16.gmra.mxu1 %vm562_vm0, %v512_v18 }
 0x12c   :  { %v1090_v25 = vpop.eup %1089  ;;  %1115 = vpow2.f32 %v849_v16  ;;  %v303_v26 = vpop.f32.mrf.mxu0 }
 0x12d   :  { %v1092_v27 = vpop.eup %1091  ;;  %1117 = vrcp.f32 %v431_v22  ;;  %v434_v28 = vadd.f32 1.0, %v1090_v25  ;;  %v850_v29 = vmul.f32 -1.442695, %v312_v24  ;;  %v304_v30 = vadd.f32 %v1244_v60, %v303_v26 }
 0x12e   :  { %v1094_v31 = vpop.eup %1093  ;;  %1119 = vpow2.f32 %v847_v23 }
 0x12f   :  { %v1096_v32 = vpop.eup %1095  ;;  %1121 = vrcp.f32 %v434_v28  ;;  %v432_v34 = vadd.f32 1.0, %v1094_v31  ;;  %v848_v35 = vmul.f32 -1.442695, %v304_v30 }
 0x130   :  { %v1098_v36 = vpop.eup %1097  ;;  %1123 = vpow2.f32 %v850_v29  ;;  %v513_v37 = vpack.c.bf16 %v1096_v32, %v1088_v21 }
 0x131   :  { %v1100_v38 = vpop.eup %1099  ;;  %1125 = vrcp.f32 %v432_v34  ;;  %v514_v39 = vpack.c.bf16 %v1092_v27, %v1098_v36 }
 0x132   :  { %v1102_v40 = vpop.eup %1101  ;;  %1127 = vpow2.f32 %v848_v35  ;;  %984 = vmatprep.mubr.msk.bf16.mxu1 %vm562_vm0, %v513_v37  ;;  %v437_v47 = vadd.f32 1.0, %v1100_v38 }
 0x133   :  { %v1104_v41 = vpop.eup %1103  ;;  %1129 = vrcp.f32 %v433_v33  ;;  %985 = vmatmul.mubr.msk.bf16.gmra.mxu1 %vm562_vm0, %v514_v39 }
 0x134   :  { %v1106_v60 = vpop.eup %1105  ;;  %v435_v42 = vadd.f32 1.0, %v1104_v41 }
 0x135   :  { %v1108_v43 = vpop.eup %1107 }
 0x136   :  { %v1110_v44 = vpop.eup %1109  ;;  %v438_v45 = vadd.f32 1.0, %v1108_v43  ;;  %1131 = vrcp.f32 %v435_v42 }
 0x137   :  { %v1112_v46 = vpop.eup %1111  ;;  %v515_v48 = vpack.c.bf16 %v1110_v44, %v1102_v40 }
 0x138   :  { %v1114_v49 = vpop.eup %1113  ;;  %v436_v50 = vadd.f32 1.0, %v1112_v46  ;;  %1133 = vrcp.f32 %v438_v45 }
 0x139   :  { %v1116_v51 = vpop.eup %1115  ;;  %988 = vmatprep.mubr.msk.bf16.mxu1 %vm562_vm0, %v515_v48  ;;  %v516_v52 = vpack.c.bf16 %v1106_v60, %v1114_v49 }
 0x13a   :  { %v1118_v53 = vpop.eup %1117  ;;  %1135 = vrcp.f32 %v436_v50  ;;  %v441_v62 = vadd.f32 1.0, %v1116_v51 }
 0x13b   :  { %v1120_v54 = vpop.eup %1119  ;;  %1137 = vrcp.f32 %v437_v47  ;;  %989 = vmatmul.mubr.msk.bf16.gmra.mxu1 %vm562_vm0, %v516_v52 }
 0x13c   :  { %v1122_v55 = vpop.eup %1121  ;;  %v439_v56 = vadd.f32 1.0, %v1120_v54 }
 0x13d   :  { %v1124_v57 = vpop.eup %1123 }
 0x13e   :  { %v1126_v58 = vpop.eup %1125  ;;  %v442_v59 = vadd.f32 1.0, %v1124_v57  ;;  %1139 = vrcp.f32 %v439_v56 }
 0x13f   :  { %v1128_v61 = vpop.eup %1127  ;;  %v517_v63 = vpack.c.bf16 %v1126_v58, %v1118_v53 }
 0x140   :  { %v1130_v0 = vpop.eup %1129  ;;  %v440_v1 = vadd.f32 1.0, %v1128_v61  ;;  %1141 = vrcp.f32 %v442_v59 }
 0x141   :  { %992 = vmatprep.mubr.msk.bf16.mxu1 %vm562_vm0, %v517_v63  ;;  %v518_v2 = vpack.c.bf16 %v1122_v55, %v1130_v0 }
 0x142   :  { %1143 = vrcp.f32 %v440_v1 }
 0x143   :  { %1145 = vrcp.f32 %v441_v62  ;;  %993 = vmatmul.mubr.msk.bf16.gmra.mxu1 %vm562_vm0, %v518_v2  ;;  %v1132_v3 = vpop.eup %1131 }
 0x145   :  { %v1134_v4 = vpop.eup %1133 }
 0x147   :  { %v1136_v5 = vpop.eup %1135 }
 0x148   :  { %v1138_v6 = vpop.eup %1137  ;;  %v519_v7 = vpack.c.bf16 %v1136_v5, %v1132_v3 }
 0x149   :  { %v520_v8 = vpack.c.bf16 %v1134_v4, %v1138_v6 }
 0x14a   :  { %996 = vmatprep.mubr.msk.bf16.mxu1 %vm562_vm0, %v519_v7 }
 0x14b   :  { %997 = vmatmul.mubr.msk.bf16.gmra.mxu1 %vm562_vm0, %v520_v8  ;;  %v1140_v9 = vpop.eup %1139 }
 0x14d   :  { %v1142_v10 = vpop.eup %1141 }
 0x14f   :  { %v1144_v11 = vpop.eup %1143 }
 0x150   :  { %v1146_v12 = vpop.eup %1145  ;;  %v521_v13 = vpack.c.bf16 %v1144_v11, %v1140_v9 }
 0x151   :  { %v522_v14 = vpack.c.bf16 %v1142_v10, %v1146_v12 }
 0x152   :  { %1000 = vmatprep.mubr.msk.bf16.mxu1 %vm562_vm0, %v521_v13 }
 0x153   :  { %1001 = vmatmul.mubr.msk.bf16.gmra.mxu1 %vm562_vm0, %v522_v14 }
 0x1da   :  { %v974_v16 = vpop.f32.mrf.mxu1 }
 0x1db   :  { %v654_v17 = vadd.f32 %v974_v16, %v1297_v15 }
 0x1dc   :  { %v645_v18 = vpop.f32.mrf.mxu1 }
 0x1dd   :  { %775 = vst.msk [vmem:[%s1464_s5 + $0x10] sm:$0xff] %vm772_vm1, %v654_v17  ;;  %v646_v19 = vadd.f32 %v1297_v15, %v645_v18 }
 0x1de   :  { %v975_v20 = vpop.f32.mrf.mxu1 }
 0x1df   :  { %773 = vst.msk [vmem:[%s1464_s5] sm:$0xff] %vm772_vm1, %v646_v19  ;;  %v657_v21 = vadd.f32 %v975_v20, %v1297_v15 }
 0x1e0   :  { %v648_v22 = vpop.f32.mrf.mxu1 }
 0x1e1   :  { %776 = vst.msk [vmem:[%s1464_s5 + $0x18] sm:$0xff] %vm772_vm1, %v657_v21  ;;  %v649_v23 = vadd.f32 %v1297_v15, %v648_v22 }
 0x1e2   :  { %v978_v24 = vpop.f32.mrf.mxu1 }
 0x1e3   :  { %774 = vst.msk [vmem:[%s1464_s5 + $0x8] sm:$0xff] %vm772_vm1, %v649_v23  ;;  %v670_v25 = vadd.f32 %v978_v24, %v1297_v15 }
 0x1e4   :  { %v661_v26 = vpop.f32.mrf.mxu1 }
 0x1e5   :  { %779 = vst.msk [vmem:[%s1464_s5 + $0x30] sm:$0xff] %vm772_vm1, %v670_v25  ;;  %v662_v27 = vadd.f32 %v1297_v15, %v661_v26 }
 0x1e6   :  { %v979_v28 = vpop.f32.mrf.mxu1 }
 0x1e7   :  { %777 = vst.msk [vmem:[%s1464_s5 + $0x20] sm:$0xff] %vm772_vm1, %v662_v27  ;;  %v673_v29 = vadd.f32 %v979_v28, %v1297_v15 }
 0x1e8   :  { %v664_v30 = vpop.f32.mrf.mxu1 }
 0x1e9   :  { %780 = vst.msk [vmem:[%s1464_s5 + $0x38] sm:$0xff] %vm772_vm1, %v673_v29  ;;  %v665_v31 = vadd.f32 %v1297_v15, %v664_v30 }
 0x1eb   :  { %778 = vst.msk [vmem:[%s1464_s5 + $0x28] sm:$0xff] %vm772_vm1, %v665_v31  ;;  %v982_v32 = vpop.f32.mrf.mxu1 }
 0x1ec   :  { %v686_v33 = vadd.f32 %v982_v32, %v1297_v15 }
 0x1ed   :  { %v677_v34 = vpop.f32.mrf.mxu1 }
 0x1ee   :  { %783 = vst.msk [vmem:[%s1464_s5 + $0x50] sm:$0xff] %vm772_vm1, %v686_v33  ;;  %v678_v35 = vadd.f32 %v1297_v15, %v677_v34 }
 0x1ef   :  { %v983_v36 = vpop.f32.mrf.mxu1 }
 0x1f0   :  { %781 = vst.msk [vmem:[%s1464_s5 + $0x40] sm:$0xff] %vm772_vm1, %v678_v35  ;;  %v689_v37 = vadd.f32 %v983_v36, %v1297_v15 }
 0x1f1   :  { %v680_v38 = vpop.f32.mrf.mxu1 }
 0x1f2   :  { %784 = vst.msk [vmem:[%s1464_s5 + $0x58] sm:$0xff] %vm772_vm1, %v689_v37  ;;  %v681_v39 = vadd.f32 %v1297_v15, %v680_v38 }
 0x1f3   :  { %v986_v40 = vpop.f32.mrf.mxu1 }
 0x1f4   :  { %782 = vst.msk [vmem:[%s1464_s5 + $0x48] sm:$0xff] %vm772_vm1, %v681_v39  ;;  %v702_v41 = vadd.f32 %v986_v40, %v1297_v15 }
 0x1f5   :  { %v693_v60 = vpop.f32.mrf.mxu1 }
 0x1f6   :  { %787 = vst.msk [vmem:[%s1464_s5 + $0x70] sm:$0xff] %vm772_vm1, %v702_v41  ;;  %v694_v42 = vadd.f32 %v1297_v15, %v693_v60 }
 0x1f7   :  { %v987_v43 = vpop.f32.mrf.mxu1 }
 0x1f8   :  { %785 = vst.msk [vmem:[%s1464_s5 + $0x60] sm:$0xff] %vm772_vm1, %v694_v42  ;;  %v705_v44 = vadd.f32 %v987_v43, %v1297_v15 }
 0x1f9   :  { %v696_v45 = vpop.f32.mrf.mxu1 }
 0x1fa   :  { %788 = vst.msk [vmem:[%s1464_s5 + $0x78] sm:$0xff] %vm772_vm1, %v705_v44  ;;  %v697_v46 = vadd.f32 %v1297_v15, %v696_v45 }
 0x1fb   :  { %v990_v47 = vpop.f32.mrf.mxu1 }
 0x1fc   :  { %786 = vst.msk [vmem:[%s1464_s5 + $0x68] sm:$0xff] %vm772_vm1, %v697_v46  ;;  %v718_v48 = vadd.f32 %v990_v47, %v1297_v15 }
 0x1fd   :  { %v709_v49 = vpop.f32.mrf.mxu1 }
 0x1fe   :  { %791 = vst.msk [vmem:[%s1464_s5 + $0x90] sm:$0xff] %vm772_vm1, %v718_v48  ;;  %v710_v50 = vadd.f32 %v1297_v15, %v709_v49 }
 0x1ff   :  { %v991_v51 = vpop.f32.mrf.mxu1 }
 0x200   :  { %789 = vst.msk [vmem:[%s1464_s5 + $0x80] sm:$0xff] %vm772_vm1, %v710_v50  ;;  %v721_v52 = vadd.f32 %v991_v51, %v1297_v15 }
 0x201   :  { %v712_v53 = vpop.f32.mrf.mxu1 }
 0x202   :  { %792 = vst.msk [vmem:[%s1464_s5 + $0x98] sm:$0xff] %vm772_vm1, %v721_v52  ;;  %v713_v54 = vadd.f32 %v1297_v15, %v712_v53 }
 0x203   :  { %v994_v55 = vpop.f32.mrf.mxu1 }
 0x204   :  { %790 = vst.msk [vmem:[%s1464_s5 + $0x88] sm:$0xff] %vm772_vm1, %v713_v54  ;;  %v734_v56 = vadd.f32 %v994_v55, %v1297_v15 }
 0x205   :  { %v725_v57 = vpop.f32.mrf.mxu1 }
 0x206   :  { %795 = vst.msk [vmem:[%s1464_s5 + $0xb0] sm:$0xff] %vm772_vm1, %v734_v56  ;;  %v726_v58 = vadd.f32 %v1297_v15, %v725_v57 }
 0x207   :  { %v995_v59 = vpop.f32.mrf.mxu1 }
 0x208   :  { %793 = vst.msk [vmem:[%s1464_s5 + $0xa0] sm:$0xff] %vm772_vm1, %v726_v58  ;;  %v737_v61 = vadd.f32 %v995_v59, %v1297_v15 }
 0x209   :  { %v728_v62 = vpop.f32.mrf.mxu1 }
 0x20a   :  { %796 = vst.msk [vmem:[%s1464_s5 + $0xb8] sm:$0xff] %vm772_vm1, %v737_v61  ;;  %v729_v63 = vadd.f32 %v1297_v15, %v728_v62 }
 0x20b   :  { %v998_v0 = vpop.f32.mrf.mxu1 }
 0x20c   :  { %794 = vst.msk [vmem:[%s1464_s5 + $0xa8] sm:$0xff] %vm772_vm1, %v729_v63  ;;  %v750_v1 = vadd.f32 %v998_v0, %v1297_v15 }
 0x20d   :  { %v741_v2 = vpop.f32.mrf.mxu1 }
 0x20e   :  { %799 = vst.msk [vmem:[%s1464_s5 + $0xd0] sm:$0xff] %vm772_vm1, %v750_v1  ;;  %v742_v3 = vadd.f32 %v1297_v15, %v741_v2 }
 0x20f   :  { %v999_v4 = vpop.f32.mrf.mxu1 }
 0x210   :  { %797 = vst.msk [vmem:[%s1464_s5 + $0xc0] sm:$0xff] %vm772_vm1, %v742_v3  ;;  %v753_v5 = vadd.f32 %v999_v4, %v1297_v15 }
 0x211   :  { %v744_v6 = vpop.f32.mrf.mxu1 }
 0x212   :  { %800 = vst.msk [vmem:[%s1464_s5 + $0xd8] sm:$0xff] %vm772_vm1, %v753_v5  ;;  %v745_v7 = vadd.f32 %v1297_v15, %v744_v6 }
 0x213   :  { %v1002_v8 = vpop.f32.mrf.mxu1 }
 0x214   :  { %798 = vst.msk [vmem:[%s1464_s5 + $0xc8] sm:$0xff] %vm772_vm1, %v745_v7  ;;  %v766_v9 = vadd.f32 %v1002_v8, %v1297_v15 }
 0x215   :  { %v757_v10 = vpop.f32.mrf.mxu1 }
 0x216   :  { %803 = vst.msk [vmem:[%s1464_s5 + $0xf0] sm:$0xff] %vm772_vm1, %v766_v9  ;;  %v758_v11 = vadd.f32 %v1297_v15, %v757_v10 }
 0x217   :  { %v1003_v12 = vpop.f32.mrf.mxu1 }
 0x218   :  { %801 = vst.msk [vmem:[%s1464_s5 + $0xe0] sm:$0xff] %vm772_vm1, %v758_v11  ;;  %v769_v13 = vadd.f32 %v1003_v12, %v1297_v15 }
 0x219   :  { %v760_v14 = vpop.f32.mrf.mxu1 }
 0x21a   :  { %804 = vst.msk [vmem:[%s1464_s5 + $0xf8] sm:$0xff] %vm772_vm1, %v769_v13  ;;  %v761_v16 = vadd.f32 %v1297_v15, %v760_v14 }
 0x21c   :  { %802 = vst.msk [vmem:[%s1464_s5 + $0xe8] sm:$0xff] %vm772_vm1, %v761_v16 }
 0x21d   :  { %809 = vsyncpa [#allocation3], 1 }

</bundles_post_ra>
